<compile_context>
chip_gen: v7x
topology: tpu7x:2x2x1
jax: 0.10.0
libtpu: 0.0.40
codegen_flags: <defaults>
</compile_context>

<pallas_src>
import functools
import math

import jax
import jax.numpy as jnp
from jax.experimental import pallas as pl
from jax.experimental.pallas import tpu as pltpu


# ----------------------------------------------------------------------------
# VMEM-aware tiling helpers
# ----------------------------------------------------------------------------
def _vmem_limit_bytes():
    """~3/4 of physical VMEM: 96 MiB on v5e/v6e (128 MiB), 48 MiB on v7x (64 MiB)."""
    try:
        cap = int(getattr(pltpu.get_tpu_info(), "vmem_capacity_bytes", 0)) or (64 << 20)
    except Exception:  # pragma: no cover - e.g. interpret mode
        cap = 64 << 20  # conservative: v7x per-core VMEM
    return (cap * 3) // 4


def _choose_tile_rows(rows, cols, n_arrays, itemsize, vmem_limit):
    """Largest sublane-aligned row tile whose double-buffered live set fits VMEM."""
    # live set per row: n_arrays tensors double-buffered + ~2 f32 temporaries.
    per_row = 2 * n_arrays * cols * itemsize + 2 * cols * 4
    budget = max(vmem_limit - (1 << 20), 1 << 20)  # 1 MiB headroom
    tile = max(1, budget // per_row)
    tile = min(tile, rows, 2048)          # >=512 rows already reaches ~85% of HBM roofline
    if rows >= 16:                        # keep >=2 grid steps so v7x's 2nd TC gets work
        tile = min(tile, -(-rows // 2))
    if tile < rows:
        tile = max(8, (tile // 8) * 8)    # sublane-aligned partial blocks
    return int(tile)


def _lane_dense_2d(shape):
    """Pick a (rows, cols) view for elementwise math; prefer cols % 128 == 0."""
    n = math.prod(shape)
    last = shape[-1]
    if last % 128 == 0:
        return n // last, last
    if n % 128 == 0:
        cols = 128
        while cols * 2 <= 4096 and n % (cols * 2) == 0:
            cols *= 2                     # wider lane-dense slabs -> unmasked vst
        return n // cols, cols
    return max(1, n // last), last        # fallback: masked stores on a narrow last dim


# ----------------------------------------------------------------------------
# Kernels
# ----------------------------------------------------------------------------
def _make_fused_residual_kernel(fn):
    """o = fn(x) + x fused in one kernel (1 HBM read + 1 HBM write)."""
    def kernel(x_ref, o_ref):
        x = x_ref[...].astype(jnp.float32)   # f32 VPU/EUP math (v5e has no bf16 VPU)
        o_ref[...] = (fn(x) + x).astype(o_ref.dtype)
    return kernel


def _residual_add_kernel(y_ref, x_ref, o_ref):
    o_ref[...] = y_ref[...] + x_ref[...]


def _elementwise_call(kernel, out_dtype, arrays_2d, rows, cols):
    vmem_limit = _vmem_limit_bytes()
    n_arrays = len(arrays_2d) + 1                    # inputs + output
    itemsize = max(a.dtype.itemsize for a in arrays_2d)
    tile = _choose_tile_rows(rows, cols, n_arrays, itemsize, vmem_limit)
    spec = pl.BlockSpec((tile, cols), lambda i: (i, 0))
    return pl.pallas_call(
        kernel,
        out_shape=jax.ShapeDtypeStruct((rows, cols), out_dtype),
        grid_spec=pltpu.PrefetchScalarGridSpec(
            num_scalar_prefetch=0,
            grid=(pl.cdiv(rows, tile),),
            in_specs=[spec] * len(arrays_2d),
            out_specs=spec,
        ),
        compiler_params=pltpu.CompilerParams(
            dimension_semantics=("parallel",),
            vmem_limit_bytes=vmem_limit,
        ),
    )(*arrays_2d)


# ----------------------------------------------------------------------------
# Public API: Residual
# ----------------------------------------------------------------------------
def residual_fused(fn, x):
    """o = fn(x) + x with elementwise `fn` fused inside one Pallas kernel."""
    shape = x.shape
    rows, cols = _lane_dense_2d(shape)
    out = _elementwise_call(_make_fused_residual_kernel(fn), x.dtype,
                            [x.reshape(rows, cols)], rows, cols)
    return out.reshape(shape)


def residual_add(y, x):
    """o = y + x as a Pallas kernel (unfused fallback for non-elementwise fn)."""
    assert y.shape == x.shape and y.dtype == x.dtype
    shape = y.shape
    rows, cols = _lane_dense_2d(shape)
    out = _elementwise_call(_residual_add_kernel, y.dtype,
                            [y.reshape(rows, cols), x.reshape(rows, cols)], rows, cols)
    return out.reshape(shape)


def residual(fn, *, fuse_elementwise=True):
    """Equivalent of enformer_pytorch `Residual`: returns x -> fn(x, **kwargs) + x.

    If `fn` is elementwise (activation functions etc.), the whole residual block
    runs as one fused Pallas kernel (1 read + 1 write).  Otherwise `fn` runs as
    plain JAX and only the shape-preserving residual add is the Pallas kernel.
    """
    # TODO(synk): arbitrary (non-elementwise) `fn` has no generic Pallas lowering;
    # it runs as plain JAX and only the residual add is a Pallas kernel.
    if fuse_elementwise:
        def wrapped(x, **kwargs):
            body = functools.partial(fn, **kwargs) if kwargs else fn
            return residual_fused(body, x)
        return wrapped

    def wrapped(x, **kwargs):
        return residual_add(fn(x, **kwargs), x)
    return wrapped


# ----------------------------------------------------------------------------
# Smoke test
# ----------------------------------------------------------------------------
if __name__ == "__main__":
    key = jax.random.PRNGKey(0)
    k1, k2 = jax.random.split(key)

    # Small shape consistent with a Residual-wrapped shape-preserving block.
    b, n, d = 2, 16, 128
    x = jax.random.normal(k1, (b, n, d), dtype=jnp.float32)

    # 1) Fused path: fn = gelu, whole residual block is one Pallas kernel.
    res_gelu = residual(jax.nn.gelu)
    out = res_gelu(x)
    jax.block_until_ready(out)
    ref = jax.nn.gelu(x) + x
    assert out.shape == x.shape
    assert jnp.allclose(out, ref, atol=1e-4, rtol=1e-4)

    # 2) Non-lane-dense trailing dim (d=32): lane-dense reshape path.
    x_small = jax.random.normal(k2, (2, 8, 32), dtype=jnp.float32)
    out_small = res_gelu(x_small)
    jax.block_until_ready(out_small)
    assert jnp.allclose(out_small, jax.nn.gelu(x_small) + x_small, atol=1e-4, rtol=1e-4)

    # 3) Unfused path: fn is a channel mix (not elementwise) -> plain JAX fn,
    #    residual add as the Pallas kernel.
    w = jax.random.normal(k2, (d, d), dtype=jnp.float32) / math.sqrt(d)
    fn_linear = lambda t: jnp.dot(t, w)
    res_linear = residual(fn_linear, fuse_elementwise=False)
    out_lin = res_linear(x)
    jax.block_until_ready(out_lin)
    assert jnp.allclose(out_lin, fn_linear(x) + x, atol=1e-4, rtol=1e-4)

    print("KERNEL_OK")
</pallas_src>

<mosaic_0001>
module attributes {stable_mosaic.version = 11 : i64} {
  func.func @kernel(%arg0: i32, %arg1: memref<16x128xf32, #tpu.memory_space<vmem>>, %arg2: memref<16x128xf32, #tpu.memory_space<vmem>>) attributes {dimension_semantics = [#tpu.dimension_semantics<parallel>], iteration_bounds = array<i64: 2>, scalar_prefetch = 0 : i64, scratch_operands = 0 : i64, tpu.core_type = #tpu.core_type<tc>, window_params = [{transform_indices = @transform_0, window_bounds = array<i64: 16, 128>}, {transform_indices = @transform_1, window_bounds = array<i64: 16, 128>}]} {
    %c0 = arith.constant 0 : index
    %c0_0 = arith.constant 0 : index
    %0 = vector.load %arg1[%c0, %c0_0] : memref<16x128xf32, #tpu.memory_space<vmem>>, vector<16x128xf32>
    %1 = arith.mulf %0, %0 : vector<16x128xf32>
    %2 = arith.mulf %0, %1 : vector<16x128xf32>
    %cst = arith.constant 4.471500e-02 : f32
    %3 = vector.broadcast %cst : f32 to vector<16x128xf32>
    %4 = arith.mulf %3, %2 : vector<16x128xf32>
    %5 = arith.addf %0, %4 : vector<16x128xf32>
    %cst_1 = arith.constant 0.797884583 : f32
    %6 = vector.broadcast %cst_1 : f32 to vector<16x128xf32>
    %7 = arith.mulf %6, %5 : vector<16x128xf32>
    %8 = math.tanh %7 : vector<16x128xf32>
    %cst_2 = arith.constant 1.000000e+00 : f32
    %9 = vector.broadcast %cst_2 : f32 to vector<16x128xf32>
    %10 = arith.addf %9, %8 : vector<16x128xf32>
    %cst_3 = arith.constant 5.000000e-01 : f32
    %11 = vector.broadcast %cst_3 : f32 to vector<16x128xf32>
    %12 = arith.mulf %11, %10 : vector<16x128xf32>
    %13 = arith.mulf %0, %12 : vector<16x128xf32>
    %14 = arith.addf %13, %0 : vector<16x128xf32>
    %c0_4 = arith.constant 0 : index
    %c0_5 = arith.constant 0 : index
    %15 = vector.load %arg2[%c0_4, %c0_5] : memref<16x128xf32, #tpu.memory_space<vmem>>, vector<16x128xf32>
    tpu.vector_store %arg2[%c0_4, %c0_5], %14 {strides = array<i32>} : memref<16x128xf32, #tpu.memory_space<vmem>>, vector<16x128xf32>,
    return
  }
  func.func @transform_0(%arg0: i32) -> (i32, i32) {
    %c0_i32 = arith.constant 0 : i32
    %c0_i32_0 = arith.constant 0 : i32
    return %arg0, %c0_i32 : i32, i32
  }
  func.func @transform_1(%arg0: i32) -> (i32, i32) {
    %c0_i32 = arith.constant 0 : i32
    %c0_i32_0 = arith.constant 0 : i32
    return %arg0, %c0_i32 : i32, i32
  }
}

</mosaic_0001>

<bundles_post_ra>
// kernel: tpu_custom_call.1
= control target key start
LH: loop header
LB: loop body
LE: loop exit
PB: predicated region body
PF: predicated region fallthrough
CT: control target
= control target key end

     0   :  { %6 = vsyncpa [#allocation3], 0  ;;  %s594_s0 = inlined_call_operand.hbm [shape: f32[32,128], index: 0, kind: input, shape index: {}]   ;;  %s595_s1 = inlined_call_operand.hbm [shape: f32[32,128], index: 1, kind: output, shape index: {}]  }
   0x1   :  { %8 = vsyncpa [#allocation3 + $0x1], 0 }
   0x2   :  { %9 = vsyncpa [#allocation4], 0 }
   0x3   :  { %11 = vsyncpa [#allocation4 + $0x1], 0  ;;  %s432_s6 = smov 0   ;;  %s434_s7 = smov 0  }
   0x4   :  { %s436_s8 = smov 0   ;;  %s438_s9 = smov 0  }
   0x5 LB: > { %s453_s10 = sadd.s32 4294967295, %s414_s9   ;;  %s248_s11 = sadd.s32 4294967294, %s414_s9   ;;  %s414_s9 = sphi %s438_s9, %s608_s9   ;;  %s410_s8 = sphi %s436_s8, %s607_s8   ;;  %s406_s7 = sphi %s434_s7, %s606_s7   ;;  %s402_s6 = sphi %s432_s6, %s605_s6  }
   0x6   : > { %s457_s12 = sadd.s32 1, %s414_s9   ;;  %s24_s13 = sadd.s32 1, %s410_s8 }
   0x7   : > { %s21_s14 = ssub.s32 %s414_s9, %s457_s12  ;;  %p31_p0 = scmp.ne.s32.totalorder %s410_s8, %s406_s7 }
   0x8   : > { %p22_p1 = scmp.eq.s32.totalorder %s21_s14, 0  ;;  %p32_p2 = scmp.eq.s32.totalorder %s414_s9, 0 }
   0x9   : > { %p37_p3 = scmp.ne.s32.totalorder %s406_s7, %s402_s6  ;;  %p38_p4 = scmp.eq.s32.totalorder %s453_s10, 0 }
   0xa   : > { %s469_s15 = scalar_select %p22_p1, %s410_s8, %s24_s13  }
   0xb   : > { %p471_p5 = por %p32_p2, %p31_p0  ;;  %p475_p6 = por %p38_p4, %p37_p3 }
   0xc   : > { %p61_p7 = scmp.eq.s32.totalorder %s453_s10, 1  ;;  %p67_p8 = scmp.eq.s32.totalorder %s248_s11, 1 }
   0xd   : > { %p276_p10 = scmp.lt.s32.totalorder %s414_s9, 2  ;;  %s87_s20 = sand.u32 1, %s410_s8  }
   0xe   : > { %p482_p11 = por %p61_p7, %p31_p0  ;;  %p486_p12 = por %p67_p8, %p37_p3 }
   0xf   : > { %s262_s21 = sshll.u32 %s414_s9, 8  ;;  %s251_s22 = sshll.u32 %s87_s20, 4 }
  0x10   : > { %s599_s18 = scalar_select %p482_p11, 1, 0 }
  0x11   : > { %s600_s19 = scalar_select %p486_p12, 1, 0 }
  0x12   : > { %s495_s25 = scalar_lea.hbm %s594_s0, %s262_s21  ;;  %s91_s26 = scalar_lea.vmem [#allocation2], %s251_s22 }
  0x13   : > { %s98_s27 = sshll.u32 %s91_s26, 4  ;;  %p499_p13 = pnand %p276_p10, %p471_p5  ;;  %s503_s27 = int_to_ptr.vmem [resolvable:$true] %s98_s27 }
  0x14   : > { %s505_s29 = scalar_lea.sflag [#allocation3], %s87_s20  ;;  %s318_s30 = scalar_lea.hbm %s495_s25, 256 }
  0x15   : > { %p319_p0 = scmp.ne.s32.totalorder %s495_s25, %s318_s30  ;;  %p320_p1 = pneg %p499_p13 }
  0x16   : > { %s323_s4 = scalar_lea.hbm %s594_s0, 512  ;;  %p324_p4 = scmp.lt.u32.totalorder %s495_s25, %s594_s0 }
  0x17   : > { %p321_p2 = pnand %p320_p1, %p319_p0  ;;  %p325_p5 = scmp.lt.u32.totalorder %s323_s4, %s318_s30 }
  0x18   : > { %p327_p8 = scmp.lt.u32.totalorder %s318_s30, %s495_s25 }
  0x19   : > { %p322_p3 = pneg %p321_p2  ;;  %p326_p7 = por %p325_p5, %p324_p4 }
  0x1b   : > { %p328_p10 = por %p327_p8, %p326_p7 }
  0x1d   : > { %p329_p9 = pnand %p328_p10, %p322_p3 }
  0x1f   : > { %332 = shalt.err (!%p329_p9)
}
  0x20   : > { %s333_s13 = scalar_lea.vmem %s503_s27, 256  ;;  %s416_s14 = smov [#allocation2]  }
  0x21   : > { %p334_p0 = scmp.ne.s32.totalorder %s503_s27, %s333_s13  ;;  %s338_s16 = sshll.u32 %s416_s14, 4  ;;  %s339_s16 = int_to_ptr.vmem [resolvable:$false] %s338_s16 }
  0x22   : > { %s340_s20 = scalar_lea.vmem %s339_s16, 512  ;;  %p341_p11 = scmp.lt.s32.totalorder %s503_s27, %s339_s16 }
  0x23   : > { %p336_p2 = pnand %p334_p0, %p320_p1  ;;  %p342_p4 = scmp.lt.s32.totalorder %s340_s20, %s333_s13 }
  0x25   : > { %p337_p12 = pneg %p336_p2  ;;  %p343_p5 = por %p342_p4, %p341_p11 }
  0x27   : > { %p344_p7 = pnand %p343_p5, %p337_p12 }
  0x29   : > { %347 = shalt.err (!%p344_p7)
}
  0x2a   : > { %s417_s21 = smov 128   ;;  %s418_s22 = smov 8  }
  0x2b   : > { %271 = dma.hbm_to_vmem [thread:$0]  (!%p499_p13), %s495_s25, 256, %s503_s27, %s505_s29, %s417_s21, %s417_s21, %s418_s22  }
  0x2c   : > { %p254_p9 = scmp.ge.s32.totalorder %s414_s9, 1  ;;  %p106_p1 = scmp.lt.s32.totalorder %s414_s9, 3 }
  0x2e   : > { %p107_p3 = pnand %p254_p9, %p106_p1 }
  0x2f   : > { %s536_s23 = sand.u32 (!%p107_p3), 1, %s406_s7  }
  0x30   : > { %110 = sbr.rel (%p107_p3) target bundleno = 102 (0x66), region = 24  ;;  %s255_s24 = sshll.u32 (!%p107_p3), %s536_s23, 4 }
  0x31   : > { %s113_s26 = scalar_lea.sflag (!%p107_p3), [#allocation3], %s536_s23  ;;  %s116_s30 = scalar_lea.vmem (!%p107_p3), [#allocation2], %s255_s24 }
  0x37   : > { %393 = dma.done.wait (%p475_p6), %s113_s26, 256  }
  0x38   : > { %395 = vsyncadd (%p475_p6), %s113_s26, 4294967040  ;;  %v137_v0 = vld [vmem:[%s116_s30] sm:$0xff]  ;;  %v138_v1 = vld [vmem:[%s116_s30 + $0x8] sm:$0xff]  ;;  %s134_s17 = scalar_lea.vmem [#allocation5], %s255_s24  ;;  %s263_s27 = sshll.u32 %s453_s10, 8 }
  0x39   : > { %v139_v2 = vmul.f32 %v137_v0, %v137_v0  ;;  %v140_v3 = vmul.f32 %v138_v1, %v138_v1  ;;  %s175_s25 = sshll.u32 %s134_s17, 4  ;;  %s550_s2 = scalar_lea.hbm %s595_s1, %s263_s27  ;;  %s545_s25 = int_to_ptr.vmem [resolvable:$true] %s175_s25 }
  0x3a   : > { %s162_s3 = scalar_lea.sflag [#allocation4], %s536_s23  ;;  %s348_s4 = scalar_lea.vmem %s545_s25, 256 }
  0x3b   : > { %v141_v4 = vmul.f32 %v139_v2, %v137_v0  ;;  %v142_v5 = vmul.f32 %v140_v3, %v138_v1  ;;  %p349_p6 = scmp.ne.s32.totalorder %s545_s25, %s348_s4  ;;  %p602_p11 = scmp.ne.s32.totalorder %s599_s18, 0 }
  0x3c   : > { %s419_s10 = smov [#allocation5]  }
  0x3d   : > { %v143_v6 = vmul.f32 0.044715, %v141_v4  ;;  %v144_v7 = vmul.f32 0.044715, %v142_v5  ;;  %p350_p12 = pnand %p349_p6, %p602_p11  ;;  %s352_s5 = sshll.u32 %s419_s10, 4  ;;  %s353_s5 = int_to_ptr.vmem [resolvable:$false] %s352_s5 }
  0x3e   : > { %s354_s11 = scalar_lea.vmem %s353_s5, 512  ;;  %p355_p8 = scmp.lt.s32.totalorder %s545_s25, %s353_s5 }
  0x3f   : > { %v145_v8 = vadd.f32 %v143_v6, %v137_v0  ;;  %v146_v9 = vadd.f32 %v144_v7, %v138_v1  ;;  %p351_p13 = pneg %p350_p12  ;;  %p356_p10 = scmp.lt.s32.totalorder %s354_s11, %s348_s4 }
  0x41   : > { %v147_v10 = vmul.f32 0.7978846, %v145_v8  ;;  %v148_v11 = vmul.f32 0.7978846, %v146_v9  ;;  %p357_p0 = por %p356_p10, %p355_p8 }
  0x43   : > { %314 = vtanh.f32 %v147_v10  ;;  %p358_p2 = pnand %p357_p0, %p351_p13 }
  0x44   : > { %316 = vtanh.f32 %v148_v11 }
  0x4d   : > { %v315_v12 = vpop.eup %314 }
  0x4e   : > { %v317_v13 = vpop.eup %316  ;;  %v151_v14 = vadd.f32 1.0, %v315_v12 }
  0x4f   : > { %v152_v15 = vadd.f32 1.0, %v317_v13 }
  0x50   : > { %v153_v16 = vmul.f32 0.5, %v151_v14 }
  0x51   : > { %v154_v17 = vmul.f32 0.5, %v152_v15 }
  0x52   : > { %v155_v18 = vmul.f32 %v153_v16, %v137_v0 }
  0x53   : > { %v156_v19 = vmul.f32 %v154_v17, %v138_v1 }
  0x54   : > { %v157_v20 = vadd.f32 %v155_v18, %v137_v0 }
  0x55   : > { %v158_v21 = vadd.f32 %v156_v19, %v138_v1 }
  0x56   : > { %159 = vst [vmem:[%s134_s17] sm:$0xff] %v157_v20 }
  0x57   : > { %160 = vst [vmem:[%s134_s17 + $0x8] sm:$0xff] %v158_v21 }
  0x58   : > { %361 = shalt.err (!%p358_p2)
}
  0x59   : > { %s362_s13 = scalar_lea.hbm %s550_s2, 256  ;;  %s366_s20 = scalar_lea.hbm %s595_s1, 512 }
  0x5a   : > { %p363_p4 = scmp.ne.s32.totalorder %s550_s2, %s362_s13  ;;  %p367_p9 = scmp.lt.u32.totalorder %s550_s2, %s595_s1 }
  0x5b   : > { %p368_p1 = scmp.lt.u32.totalorder %s366_s20, %s362_s13  ;;  %p370_p6 = scmp.lt.u32.totalorder %s362_s13, %s550_s2 }
  0x5c   : > { %p364_p5 = pnand %p363_p4, %p602_p11 }
  0x5d   : > { %p369_p3 = por %p368_p1, %p367_p9 }
  0x5e   : > { %p365_p7 = pneg %p364_p5 }
  0x5f   : > { %p371_p12 = por %p370_p6, %p369_p3 }
  0x61   : > { %p372_p13 = pnand %p371_p12, %p365_p7 }
  0x63   : > { %375 = shalt.err (!%p372_p13)
}
  0x64   : > { %s420_s24 = smov 128   ;;  %s421_s26 = smov 8  }
  0x65   : > { %266 = dma.vmem_to_hbm [thread:$0]  (%p602_p11), %s545_s25, 256, %s550_s2, %s162_s3, %s420_s24, %s420_s24, %s421_s26  }
  0x66 PF: > { %s190_s30 = sand.u32 1, %s402_s6   ;;  %p603_p8 = scmp.ne.s32.totalorder %s600_s19, 0 }
  0x67   : > { %p604_p10 = scmp.ge.s32.totalorder %s414_s9, 2  ;;  %s191_s17 = scalar_lea.sflag [#allocation4], %s190_s30 }
  0x69   : > { %p273_p0 = pnand %p604_p10, %p603_p8 }
  0x6b   : > { %397 = dma.done.wait (!%p273_p0), %s191_s17, 256  }
  0x6c   : > { %399 = vsyncadd (!%p273_p0), %s191_s17, 4294967040  ;;  %p14_p2 = scmp.ge.s32.totalorder %s457_s12, 4   ;;  %s605_s6 = smov %s406_s7 }
  0x6d   : > { %s606_s7 = smov %s410_s8  ;;  %s607_s8 = smov %s469_s15 }
  0x6e   : > { %s608_s9 = smov %s457_s12  ;;  %16 = sbr.rel (!%p14_p2) target bundleno = 5 (0x5), region = 69 }
  0x75   :  { %196 = vsyncpa [#allocation3], 1 }
  0x76   :  { %198 = vsyncpa [#allocation3 + $0x1], 1 }
  0x77   :  { %199 = vsyncpa [#allocation4], 1 }
  0x78   :  { %201 = vsyncpa [#allocation4 + $0x1], 1 }

</bundles_post_ra>
